<compile_context>
chip_gen: v5e
topology: v5e:2x2
jax: 0.10.0
libtpu: 0.0.40
codegen_flags: <defaults>
</compile_context>

<pallas_src>
import jax
import jax.numpy as jnp
from jax.experimental import pallas as pl
from jax.experimental.pallas import tpu as pltpu

# ----------------------------- configuration --------------------------------
NUM_NODES = 4
Z_DIM = 8
H_DIM_LIST = [32, 64, 16]          # dim_input=32, hidden=64, dim_output=16
BATCH = 8
CLIP_LO, CLIP_HI = -5.0, 5.0

DIM_IN = H_DIM_LIST[0]
H1 = H_DIM_LIST[1]
DIM_OUT = H_DIM_LIST[-1]

X_DIM = NUM_NODES * Z_DIM + NUM_NODES          # 36 : [z | action] fused input
OUT_DIM = NUM_NODES * Z_DIM                    # 32

# Branch selection (matches the torch __init__ logic for these sizes):
#  - input embedding : z_dim+1 (=9) <= 2*dim_input (=64)  -> Linear(9,32)+ReLU
#  - output embedding: dim_output (=16) <= 2*z_dim (=16)  -> Linear(16,8)+ReLU+Linear(8,8)
assert Z_DIM + 1 <= 2 * DIM_IN
assert not (DIM_OUT > 2 * Z_DIM)


# ------------------------------- kernel --------------------------------------
def recourse_kernel(x_ref,
                    win_ref, bin_ref,
                    w1_ref, b1_ref, w2_ref, b2_ref,
                    wo1_ref, bo1_ref, wo2_ref, bo2_ref,
                    out_ref):
    x = x_ref[...]                                   # bf16 (Bt, 36) = [z | a]

    # fused per-node input embeddings: one block-diagonal matmul over [z | a]
    h = jnp.dot(x, win_ref[...], preferred_element_type=jnp.float32) + bin_ref[...]
    h = jnp.maximum(h, 0.0)                          # (Bt, N*DIM_IN)  = (., 128)

    # shared predictor MLP, replicated on the block diagonal (apply_last=True)
    h = jnp.dot(h.astype(jnp.bfloat16), w1_ref[...],
                preferred_element_type=jnp.float32) + b1_ref[...]
    h = jnp.maximum(h, 0.0)                          # (Bt, N*H1)      = (., 256)
    h = jnp.dot(h.astype(jnp.bfloat16), w2_ref[...],
                preferred_element_type=jnp.float32) + b2_ref[...]
    h = jnp.maximum(h, 0.0)                          # (Bt, N*DIM_OUT) = (., 64)

    # per-node output embeddings (block-diagonal): Linear -> ReLU -> Linear
    h = jnp.dot(h.astype(jnp.bfloat16), wo1_ref[...],
                preferred_element_type=jnp.float32) + bo1_ref[...]
    h = jnp.maximum(h, 0.0)                          # (Bt, N*Z_DIM)   = (., 32)
    zi = jnp.dot(h.astype(jnp.bfloat16), wo2_ref[...],
                 preferred_element_type=jnp.float32) + bo2_ref[...]

    # clamp + single full-width store
    out_ref[...] = jnp.clip(zi, CLIP_LO, CLIP_HI)


# ---------------------- block-diagonal parameter folding ----------------------
def _block_diag(blocks):
    """(N, r, c) stacked blocks -> (N*r, N*c) block-diagonal matrix."""
    n, r, c = blocks.shape
    eye = jnp.eye(n, dtype=blocks.dtype)
    return jnp.einsum('ij,iab->iajb', eye, blocks).reshape(n * r, n * c)


def build_block_params(params):
    """Fold per-node / shared weights into block-diagonal bf16 form (done once).
    Weights -> bf16 (halves DMA + MXU passes), biases stay f32 (added to the
    f32 accumulator)."""
    (w_in, b_in, w1, b1, w2, b2, wo1, bo1, wo2, bo2) = params
    wz = _block_diag(w_in[:, :Z_DIM, :])                       # (N*Z_DIM, N*DIM_IN)
    wa = _block_diag(w_in[:, Z_DIM:Z_DIM + 1, :])              # (N,       N*DIM_IN)
    # fuse z/a input matmuls: [z | a] @ [[Wz],[Wa]]
    win_full = jnp.concatenate([wz, wa], axis=0).astype(jnp.bfloat16)   # (36, 128)
    bin_c = b_in.reshape(1, NUM_NODES * DIM_IN)
    w1b = _block_diag(jnp.tile(w1[None], (NUM_NODES, 1, 1))).astype(jnp.bfloat16)  # (128, 256)
    b1c = jnp.tile(b1, (1, NUM_NODES))
    w2b = _block_diag(jnp.tile(w2[None], (NUM_NODES, 1, 1))).astype(jnp.bfloat16)  # (256, 64)
    b2c = jnp.tile(b2, (1, NUM_NODES))
    wo1b = _block_diag(wo1).astype(jnp.bfloat16)               # (64, 32)
    bo1c = bo1.reshape(1, NUM_NODES * Z_DIM)
    wo2b = _block_diag(wo2).astype(jnp.bfloat16)               # (32, 32)
    bo2c = bo2.reshape(1, NUM_NODES * Z_DIM)
    return (win_full, bin_c, w1b, b1c, w2b, b2c, wo1b, bo1c, wo2b, bo2c)


# ------------------------------- wrapper --------------------------------------
def recourse_forward(z, action, block_params, *, batch_tile=256):
    """Fused forward.

    B <= batch_tile : one grid-less call (whole problem resident in VMEM).
    B  > batch_tile : zero-pad B up to a tile multiple, run a batch-tiled
                      'parallel' grid (megacore split on v7x, weights resident
                      across steps), then slice the padded rows off.
    batch_tile default 256 fills a v6e/v7x MXU M-pass (two passes on v5e's
    128x128 MXU) and keeps per-step VMEM footprint ~0.5 MB.
    """
    B = z.shape[0]
    # fuse inputs once on the wrapper side; bf16 halves input DMA as well
    x = jnp.concatenate([z, action], axis=1).astype(jnp.bfloat16)   # (B, 36)
    out_dtype = jnp.float32
    n_args = 1 + len(block_params)

    if B <= batch_tile:
        # single grid-less call: total footprint well under any scoped VMEM limit
        return pl.pallas_call(
            recourse_kernel,
            out_shape=jax.ShapeDtypeStruct((B, OUT_DIM), out_dtype),
            in_specs=[pl.BlockSpec(memory_space=pltpu.MemorySpace.VMEM)] * n_args,
            out_specs=pl.BlockSpec(memory_space=pltpu.MemorySpace.VMEM),
        )(x, *block_params)

    # batch-tiled path: pad to a tile multiple so large / ragged B never falls
    # back to a single huge VMEM-resident call.
    b_pad = ((B + batch_tile - 1) // batch_tile) * batch_tile
    if b_pad != B:
        x = jnp.pad(x, ((0, b_pad - B), (0, 0)))

    batched = lambda i: (i, 0)
    fixed = lambda i: (0, 0)
    in_specs = [pl.BlockSpec((batch_tile, X_DIM), batched)]
    in_specs += [pl.BlockSpec(p.shape, fixed) for p in block_params]
    out = pl.pallas_call(
        recourse_kernel,
        out_shape=jax.ShapeDtypeStruct((b_pad, OUT_DIM), out_dtype),
        grid=(b_pad // batch_tile,),
        in_specs=in_specs,
        out_specs=pl.BlockSpec((batch_tile, OUT_DIM), batched),
        compiler_params=pltpu.CompilerParams(dimension_semantics=("parallel",)),
    )(x, *block_params)
    return out[:B]


# --------------------------- parameter creation -------------------------------
def make_params(key):
    ks = jax.random.split(key, 12)
    s = 0.1
    w_in = s * jax.random.normal(ks[0], (NUM_NODES, Z_DIM + 1, DIM_IN), jnp.float32)
    b_in = s * jax.random.normal(ks[1], (NUM_NODES, 1, DIM_IN), jnp.float32)
    w1 = s * jax.random.normal(ks[2], (DIM_IN, H1), jnp.float32)
    b1 = s * jax.random.normal(ks[3], (1, H1), jnp.float32)
    w2 = s * jax.random.normal(ks[4], (H1, DIM_OUT), jnp.float32)
    b2 = s * jax.random.normal(ks[5], (1, DIM_OUT), jnp.float32)
    wo1 = s * jax.random.normal(ks[6], (NUM_NODES, DIM_OUT, Z_DIM), jnp.float32)
    bo1 = s * jax.random.normal(ks[7], (NUM_NODES, 1, Z_DIM), jnp.float32)
    wo2 = s * jax.random.normal(ks[8], (NUM_NODES, Z_DIM, Z_DIM), jnp.float32)
    bo2 = s * jax.random.normal(ks[9], (NUM_NODES, 1, Z_DIM), jnp.float32)
    return (w_in, b_in, w1, b1, w2, b2, wo1, bo1, wo2, bo2)


# ------------------------------ pure-JAX ref -----------------------------------
def reference_forward(z, action, params):
    (w_in, b_in, w1, b1, w2, b2, wo1, bo1, wo2, bo2) = params
    outs = []
    for i in range(NUM_NODES):
        z_i = z[:, i * Z_DIM:(i + 1) * Z_DIM]
        a_i = action[:, i:i + 1]
        zx = jnp.concatenate([z_i, a_i], axis=1)
        h = jax.nn.relu(zx @ w_in[i] + b_in[i])
        h = jax.nn.relu(h @ w1 + b1)
        h = jax.nn.relu(h @ w2 + b2)
        h = jax.nn.relu(h @ wo1[i] + bo1[i])
        zi = h @ wo2[i] + bo2[i]
        outs.append(jnp.clip(zi, CLIP_LO, CLIP_HI))
    return jnp.concatenate(outs, axis=1)


# --------------------------------- main ----------------------------------------
if __name__ == "__main__":
    key = jax.random.PRNGKey(0)
    k_p, k_z, k_a, k_z2, k_a2 = jax.random.split(key, 5)

    params = make_params(k_p)
    block_params = build_block_params(params)          # folded once, reused

    # small batch -> grid-less single call
    z = jax.random.normal(k_z, (BATCH, NUM_NODES * Z_DIM), jnp.float32)
    action = jax.random.normal(k_a, (BATCH, NUM_NODES), jnp.float32)
    out = jax.block_until_ready(recourse_forward(z, action, block_params))
    ref = jax.block_until_ready(reference_forward(z, action, params))
    assert out.shape == (BATCH, NUM_NODES * Z_DIM)
    assert jnp.all(jnp.isfinite(out))
    assert jnp.allclose(out, ref, rtol=1e-2, atol=1e-2), "mismatch vs reference (small batch)"

    # larger, non-divisible batch -> padded, batch-tiled "parallel" grid path
    B2 = 300                                            # pads to 512 -> 2 grid steps
    z2 = jax.random.normal(k_z2, (B2, NUM_NODES * Z_DIM), jnp.float32)
    a2 = jax.random.normal(k_a2, (B2, NUM_NODES), jnp.float32)
    out2 = jax.block_until_ready(recourse_forward(z2, a2, block_params, batch_tile=256))
    ref2 = jax.block_until_ready(reference_forward(z2, a2, params))
    assert out2.shape == (B2, NUM_NODES * Z_DIM)
    assert jnp.all(jnp.isfinite(out2))
    assert jnp.allclose(out2, ref2, rtol=1e-2, atol=1e-2), "mismatch vs reference (tiled batch)"

    print("KERNEL_OK")
</pallas_src>

<mosaic_0001>
module attributes {stable_mosaic.version = 11 : i64} {
  func.func @recourse_kernel(%arg0: memref<8x36xbf16, #tpu.memory_space<vmem>>, %arg1: memref<36x128xbf16, #tpu.memory_space<vmem>>, %arg2: memref<1x128xf32, #tpu.memory_space<vmem>>, %arg3: memref<128x256xbf16, #tpu.memory_space<vmem>>, %arg4: memref<1x256xf32, #tpu.memory_space<vmem>>, %arg5: memref<256x64xbf16, #tpu.memory_space<vmem>>, %arg6: memref<1x64xf32, #tpu.memory_space<vmem>>, %arg7: memref<64x32xbf16, #tpu.memory_space<vmem>>, %arg8: memref<1x32xf32, #tpu.memory_space<vmem>>, %arg9: memref<32x32xbf16, #tpu.memory_space<vmem>>, %arg10: memref<1x32xf32, #tpu.memory_space<vmem>>, %arg11: memref<8x32xf32, #tpu.memory_space<vmem>>) attributes {dimension_semantics = [], scalar_prefetch = 0 : i64, scratch_operands = 0 : i64, tpu.core_type = #tpu.core_type<tc>} {
    %c0 = arith.constant 0 : index
    %c0_0 = arith.constant 0 : index
    %0 = vector.load %arg0[%c0, %c0_0] : memref<8x36xbf16, #tpu.memory_space<vmem>>, vector<8x36xbf16>
    %c0_1 = arith.constant 0 : index
    %c0_2 = arith.constant 0 : index
    %1 = vector.load %arg1[%c0_1, %c0_2] : memref<36x128xbf16, #tpu.memory_space<vmem>>, vector<36x128xbf16>
    %cst = arith.constant dense<0.000000e+00> : vector<8x128xf32>
    %2 = tpu.matmul %0, %1, %cst {dimension_numbers = #tpu.dot_dimension_numbers<[1], [0], [0], [1], [0, 0, 1, 1], [], []>} : vector<8x36xbf16>, vector<36x128xbf16>, vector<8x128xf32> -> vector<8x128xf32>
    %c0_3 = arith.constant 0 : index
    %c0_4 = arith.constant 0 : index
    %3 = vector.load %arg2[%c0_3, %c0_4] : memref<1x128xf32, #tpu.memory_space<vmem>>, vector<1x128xf32>
    %4 = vector.broadcast %3 : vector<1x128xf32> to vector<8x128xf32>
    %5 = arith.addf %2, %4 : vector<8x128xf32>
    %cst_5 = arith.constant 0.000000e+00 : f32
    %6 = vector.broadcast %cst_5 : f32 to vector<8x128xf32>
    %7 = arith.maximumf %5, %6 : vector<8x128xf32>
    %8 = arith.truncf %7 : vector<8x128xf32> to vector<8x128xbf16>
    %c0_6 = arith.constant 0 : index
    %c0_7 = arith.constant 0 : index
    %9 = vector.load %arg3[%c0_6, %c0_7] : memref<128x256xbf16, #tpu.memory_space<vmem>>, vector<128x256xbf16>
    %cst_8 = arith.constant dense<0.000000e+00> : vector<8x256xf32>
    %10 = tpu.matmul %8, %9, %cst_8 {dimension_numbers = #tpu.dot_dimension_numbers<[1], [0], [0], [1], [0, 0, 1, 1], [], []>} : vector<8x128xbf16>, vector<128x256xbf16>, vector<8x256xf32> -> vector<8x256xf32>
    %c0_9 = arith.constant 0 : index
    %c0_10 = arith.constant 0 : index
    %11 = vector.load %arg4[%c0_9, %c0_10] : memref<1x256xf32, #tpu.memory_space<vmem>>, vector<1x256xf32>
    %12 = vector.broadcast %11 : vector<1x256xf32> to vector<8x256xf32>
    %13 = arith.addf %10, %12 : vector<8x256xf32>
    %cst_11 = arith.constant 0.000000e+00 : f32
    %14 = vector.broadcast %cst_11 : f32 to vector<8x256xf32>
    %15 = arith.maximumf %13, %14 : vector<8x256xf32>
    %16 = arith.truncf %15 : vector<8x256xf32> to vector<8x256xbf16>
    %c0_12 = arith.constant 0 : index
    %c0_13 = arith.constant 0 : index
    %17 = vector.load %arg5[%c0_12, %c0_13] : memref<256x64xbf16, #tpu.memory_space<vmem>>, vector<256x64xbf16>
    %cst_14 = arith.constant dense<0.000000e+00> : vector<8x64xf32>
    %18 = tpu.matmul %16, %17, %cst_14 {dimension_numbers = #tpu.dot_dimension_numbers<[1], [0], [0], [1], [0, 0, 1, 1], [], []>} : vector<8x256xbf16>, vector<256x64xbf16>, vector<8x64xf32> -> vector<8x64xf32>
    %c0_15 = arith.constant 0 : index
    %c0_16 = arith.constant 0 : index
    %19 = vector.load %arg6[%c0_15, %c0_16] : memref<1x64xf32, #tpu.memory_space<vmem>>, vector<1x64xf32>
    %20 = vector.broadcast %19 : vector<1x64xf32> to vector<8x64xf32>
    %21 = arith.addf %18, %20 : vector<8x64xf32>
    %cst_17 = arith.constant 0.000000e+00 : f32
    %22 = vector.broadcast %cst_17 : f32 to vector<8x64xf32>
    %23 = arith.maximumf %21, %22 : vector<8x64xf32>
    %24 = arith.truncf %23 : vector<8x64xf32> to vector<8x64xbf16>
    %c0_18 = arith.constant 0 : index
    %c0_19 = arith.constant 0 : index
    %25 = vector.load %arg7[%c0_18, %c0_19] : memref<64x32xbf16, #tpu.memory_space<vmem>>, vector<64x32xbf16>
    %cst_20 = arith.constant dense<0.000000e+00> : vector<8x32xf32>
    %26 = tpu.matmul %24, %25, %cst_20 {dimension_numbers = #tpu.dot_dimension_numbers<[1], [0], [0], [1], [0, 0, 1, 1], [], []>} : vector<8x64xbf16>, vector<64x32xbf16>, vector<8x32xf32> -> vector<8x32xf32>
    %c0_21 = arith.constant 0 : index
    %c0_22 = arith.constant 0 : index
    %27 = vector.load %arg8[%c0_21, %c0_22] : memref<1x32xf32, #tpu.memory_space<vmem>>, vector<1x32xf32>
    %28 = vector.broadcast %27 : vector<1x32xf32> to vector<8x32xf32>
    %29 = arith.addf %26, %28 : vector<8x32xf32>
    %cst_23 = arith.constant 0.000000e+00 : f32
    %30 = vector.broadcast %cst_23 : f32 to vector<8x32xf32>
    %31 = arith.maximumf %29, %30 : vector<8x32xf32>
    %32 = arith.truncf %31 : vector<8x32xf32> to vector<8x32xbf16>
    %c0_24 = arith.constant 0 : index
    %c0_25 = arith.constant 0 : index
    %33 = vector.load %arg9[%c0_24, %c0_25] : memref<32x32xbf16, #tpu.memory_space<vmem>>, vector<32x32xbf16>
    %cst_26 = arith.constant dense<0.000000e+00> : vector<8x32xf32>
    %34 = tpu.matmul %32, %33, %cst_26 {dimension_numbers = #tpu.dot_dimension_numbers<[1], [0], [0], [1], [0, 0, 1, 1], [], []>} : vector<8x32xbf16>, vector<32x32xbf16>, vector<8x32xf32> -> vector<8x32xf32>
    %c0_27 = arith.constant 0 : index
    %c0_28 = arith.constant 0 : index
    %35 = vector.load %arg10[%c0_27, %c0_28] : memref<1x32xf32, #tpu.memory_space<vmem>>, vector<1x32xf32>
    %36 = vector.broadcast %35 : vector<1x32xf32> to vector<8x32xf32>
    %37 = arith.addf %34, %36 : vector<8x32xf32>
    %cst_29 = arith.constant -5.000000e+00 : f32
    %cst_30 = arith.constant 5.000000e+00 : f32
    %38 = vector.broadcast %cst_29 : f32 to vector<8x32xf32>
    %39 = arith.maximumf %38, %37 : vector<8x32xf32>
    %40 = vector.broadcast %cst_30 : f32 to vector<8x32xf32>
    %41 = arith.minimumf %40, %39 : vector<8x32xf32>
    %c0_31 = arith.constant 0 : index
    %c0_32 = arith.constant 0 : index
    %42 = vector.load %arg11[%c0_31, %c0_32] : memref<8x32xf32, #tpu.memory_space<vmem>>, vector<8x32xf32>
    tpu.vector_store %arg11[%c0_31, %c0_32], %41 {strides = array<i32>} : memref<8x32xf32, #tpu.memory_space<vmem>>, vector<8x32xf32>,
    return
  }
}

</mosaic_0001>

<bundles_post_ra>
// kernel: tpu_custom_call.1
= control target key start
LH: loop header
LB: loop body
LE: loop exit
PB: predicated region body
PF: predicated region fallthrough
CT: control target
= control target key end

     0   :  { %vm69_vm0 = vcmask 1041408   ;;  %s979_s0 = inlined_call_operand.vmem [shape: bf16[8,36], index: 0, kind: input, shape index: {}]   ;;  %s980_s1 = inlined_call_operand.vmem [shape: bf16[36,128], index: 1, kind: input, shape index: {}]   ;;  %s981_s2 = inlined_call_operand.vmem [shape: f32[1,128], index: 2, kind: input, shape index: {}]   ;;  %s982_s3 = inlined_call_operand.vmem [shape: bf16[128,256], index: 3, kind: input, shape index: {}]   ;;  %s983_s4 = inlined_call_operand.vmem [shape: f32[1,256], index: 4, kind: input, shape index: {}]   ;;  %s984_s5 = inlined_call_operand.vmem [shape: bf16[256,64], index: 5, kind: input, shape index: {}]   ;;  %s985_s6 = inlined_call_operand.vmem [shape: f32[1,64], index: 6, kind: input, shape index: {}]   ;;  %s986_s7 = inlined_call_operand.vmem [shape: bf16[64,32], index: 7, kind: input, shape index: {}]   ;;  %s987_s8 = inlined_call_operand.vmem [shape: f32[1,32], index: 8, kind: input, shape index: {}]   ;;  %s988_s9 = inlined_call_operand.vmem [shape: bf16[32,32], index: 9, kind: input, shape index: {}]   ;;  %s989_s10 = inlined_call_operand.vmem [shape: f32[1,32], index: 10, kind: input, shape index: {}]   ;;  %s990_s11 = inlined_call_operand.hbm [shape: f32[8,32], index: 11, kind: output, shape index: {}]  }
   0x1   :  { %v45_v0 = vld [vmem:[%s980_s1 + $0x10] sm:$0x3]  ;;  %v672_v3 = vld [vmem:[%s982_s3 + $0x74] sm:$0xf0]  ;;  %v671_v5 = vld [vmem:[%s982_s3 + $0x74] sm:$0xf] }
   0x2   :  { %v59_v1 = vunpack.c.l.b16 %v45_v0  ;;  %v558_v2 = vld [vmem:[%s982_s3 + $0x70] sm:$0xf]  ;;  %v560_v6 = vld [vmem:[%s982_s3 + $0x78] sm:$0xf0]  ;;  %v550_v7 = vld [vmem:[%s982_s3 + $0x60] sm:$0xf] }
   0x3   :  { %v559_v4 = vor.u32 %v672_v3, %v558_v2  ;;  %v563_v9 = vor.u32 %v671_v5, %v560_v6  ;;  %v670_v10 = vld [vmem:[%s982_s3 + $0x64] sm:$0xf0]  ;;  %v669_v11 = vld [vmem:[%s982_s3 + $0x64] sm:$0xf]  ;;  %v552_v12 = vld [vmem:[%s982_s3 + $0x68] sm:$0xf0] }
   0x4   :  { %v62_v8 = vpack.c.b16 %v59_v1, %v59_v1  ;;  %v551_v13 = vor.u32 %v670_v10, %v550_v7  ;;  %v555_v15 = vor.u32 %v669_v11, %v552_v12  ;;  %v542_v16 = vld [vmem:[%s982_s3 + $0x50] sm:$0xf]  ;;  %v668_v17 = vld [vmem:[%s982_s3 + $0x54] sm:$0xf0]  ;;  %v656_v18 = vld [vmem:[%s980_s1 + $0x8] sm:$0xff] }
   0x5   :  { %190 = vmatpush.bf16.msra.mxu1 %v559_v4  ;;  %203 = vmatpush.bf16.msra.mxu2 %v563_v9  ;;  %v667_v19 = vld [vmem:[%s982_s3 + $0x54] sm:$0xf]  ;;  %v544_v20 = vld [vmem:[%s982_s3 + $0x58] sm:$0xf0]  ;;  %v655_v21 = vld [vmem:[%s980_s1] sm:$0xff]  ;;  %v543_v22 = vor.u32 %v668_v17, %v542_v16 }
   0x6   :  { %v71_v14 = vsel %vm69_vm0, %v62_v8, 0  ;;  %v534_v23 = vld [vmem:[%s982_s3 + $0x40] sm:$0xf]  ;;  %v547_v24 = vor.u32 %v667_v19, %v544_v20  ;;  %v666_v25 = vld [vmem:[%s982_s3 + $0x44] sm:$0xf0] }
   0x7   :  { %78 = vmatpush.bf16.msra.mxu0 %v71_v14  ;;  %v665_v26 = vld [vmem:[%s982_s3 + $0x44] sm:$0xf]  ;;  %v536_v27 = vld [vmem:[%s982_s3 + $0x48] sm:$0xf0] }
   0x9   :  { %191 = vmatpush.bf16.msra.mxu1 %v551_v13  ;;  %204 = vmatpush.bf16.msra.mxu2 %v555_v15 }
   0xb   :  { %79 = vmatpush.bf16.msra.mxu0 %v656_v18 }
   0xc   :  { %16 = vsyncpa [#allocation3], 0  ;;  %v535_v28 = vor.u32 %v666_v25, %v534_v23  ;;  %vm65_vm1 = vcmask 293888   ;;  %v539_v29 = vor.u32 %v665_v26, %v536_v27  ;;  %v526_v30 = vld [vmem:[%s982_s3 + $0x30] sm:$0xf]  ;;  %v680_v55 = vld [vmem:[%s984_s5 + $0x38] sm:$0xff] }
   0xd   :  { %192 = vmatpush.bf16.msra.mxu1 %v543_v22  ;;  %205 = vmatpush.bf16.msra.mxu2 %v547_v24  ;;  %v664_v31 = vld [vmem:[%s982_s3 + $0x34] sm:$0xf0]  ;;  %v40_v32 = vld [vmem:[%s979_s0] sm:$0xf]  ;;  %v663_v33 = vld [vmem:[%s982_s3 + $0x34] sm:$0xf] }
   0xe   :  { %v528_v34 = vld [vmem:[%s982_s3 + $0x38] sm:$0xf0]  ;;  %v527_v35 = vor.u32 %v664_v31, %v526_v30  ;;  %v518_v37 = vld [vmem:[%s982_s3 + $0x20] sm:$0xf]  ;;  %v662_v38 = vld [vmem:[%s982_s3 + $0x24] sm:$0xf0]  ;;  %352 = vmatpush.bf16.msra.mxu3 %v680_v55 }
   0xf   :  { %80 = vmatpush.bf16.msra.mxu0 %v655_v21  ;;  %v531_v36 = vor.u32 %v663_v33, %v528_v34  ;;  %v661_v39 = vld [vmem:[%s982_s3 + $0x24] sm:$0xf]  ;;  %v520_v40 = vld [vmem:[%s982_s3 + $0x28] sm:$0xf0]  ;;  %v519_v41 = vor.u32 %v662_v38, %v518_v37  ;;  %v510_v43 = vld [vmem:[%s982_s3 + $0x10] sm:$0xf] }
  0x10   :  { %v523_v42 = vor.u32 %v661_v39, %v520_v40  ;;  %v660_v44 = vld [vmem:[%s982_s3 + $0x14] sm:$0xf0]  ;;  %v659_v45 = vld [vmem:[%s982_s3 + $0x14] sm:$0xf]  ;;  %v512_v47 = vld [vmem:[%s982_s3 + $0x18] sm:$0xf0] }
  0x11   :  { %193 = vmatpush.bf16.msra.mxu1 %v535_v28  ;;  %206 = vmatpush.bf16.msra.mxu2 %v539_v29  ;;  %v511_v46 = vor.u32 %v660_v44, %v510_v43  ;;  %v515_v48 = vor.u32 %v659_v45, %v512_v47  ;;  %v502_v49 = vld [vmem:[%s982_s3] sm:$0xf]  ;;  %v658_v50 = vld [vmem:[%s982_s3 + $0x4] sm:$0xf0]  ;;  %v657_v51 = vld [vmem:[%s982_s3 + $0x4] sm:$0xf] }
  0x12   :  { %499 = vmatmul.msk.bf16.vlgmr.msra.gmra.mxu0 %vm65_vm1, %v40_v32  ;;  %v503_v52 = vor.u32 %v658_v50, %v502_v49  ;;  %v504_v53 = vld [vmem:[%s982_s3 + $0x8] sm:$0xf0]  ;;  %v688_v56 = vld [vmem:[%s984_s5 + $0x78] sm:$0xff]  ;;  %v679_v57 = vld [vmem:[%s984_s5 + $0x30] sm:$0xff]  ;;  %vm416_vm2 = vcmask 523264   ;;  %vm455_vm3 = vcmask 261120  }
  0x13   :  { %v507_v54 = vor.u32 %v657_v51, %v504_v53  ;;  %365 = vmatpush.bf16.msrb.mxu0 %v688_v56  ;;  %v687_v58 = vld [vmem:[%s984_s5 + $0x70] sm:$0xff]  ;;  %353 = vmatpush.bf16.msra.mxu3 %v679_v57  ;;  %v678_v59 = vld [vmem:[%s984_s5 + $0x28] sm:$0xff]  ;;  %v677_v61 = vld [vmem:[%s984_s5 + $0x20] sm:$0xff]  ;;  %s726_s13 = smov [#allocation2]   ;;  %s482_s16 = sshll.u32 %s990_s11, 4  ;;  %s483_s16 = int_to_ptr.hbm [resolvable:$true] %s482_s16 }
  0x14   :  { %v686_v60 = vld [vmem:[%s984_s5 + $0x68] sm:$0xff]  ;;  %v685_v62 = vld [vmem:[%s984_s5 + $0x60] sm:$0xff]  ;;  %v676_v63 = vld [vmem:[%s984_s5 + $0x18] sm:$0xff]  ;;  %s480_s14 = sshll.u32 %s726_s13, 4  ;;  %s481_s14 = int_to_ptr.vmem [resolvable:$true] %s480_s14 }
  0x15   :  { %194 = vmatpush.bf16.msra.mxu1 %v527_v35  ;;  %207 = vmatpush.bf16.msra.mxu2 %v531_v36  ;;  %v684_v0 = vld [vmem:[%s984_s5 + $0x58] sm:$0xff]  ;;  %v675_v1 = vld [vmem:[%s984_s5 + $0x10] sm:$0xff]  ;;  %v696_v2 = vld [vmem:[%s981_s2] ss:$0 sm:$0xff] }
  0x16   :  { %v674_v8 = vld [vmem:[%s984_s5 + $0x8] sm:$0xff]  ;;  %v683_v9 = vld [vmem:[%s984_s5 + $0x50] sm:$0xff]  ;;  %v673_v10 = vld [vmem:[%s984_s5] sm:$0xff] }
  0x17   :  { %366 = vmatpush.bf16.msrb.mxu0 %v687_v58  ;;  %354 = vmatpush.bf16.msra.mxu3 %v678_v59  ;;  %v682_v11 = vld [vmem:[%s984_s5 + $0x48] sm:$0xff]  ;;  %v681_v12 = vld [vmem:[%s984_s5 + $0x40] sm:$0xff]  ;;  %v692_v13 = vld [vmem:[%s986_s7 + $0x18] sm:$0xff] }
  0x18   :  { %v691_v14 = vld [vmem:[%s986_s7 + $0x10] sm:$0xff]  ;;  %v104_v15 = vld [vmem:[%s983_s4] sm:$0x3]  ;;  %v690_v28 = vld [vmem:[%s986_s7 + $0x8] sm:$0xff] }
  0x19   :  { %195 = vmatpush.bf16.msra.mxu1 %v519_v41  ;;  %208 = vmatpush.bf16.msra.mxu2 %v523_v42  ;;  %v106_v16 = vperm.slane %v104_v15, 0  ;;  %v107_v20 = vperm.slane %v104_v15, 1  ;;  %v689_v29 = vld [vmem:[%s986_s7] sm:$0xff]  ;;  %v694_v30 = vld [vmem:[%s988_s9 + $0x8] sm:$0xff] }
  0x1a   :  { %v693_v31 = vld [vmem:[%s988_s9] sm:$0xff] }
  0x1b   :  { %367 = vmatpush.bf16.msrb.mxu0 %v686_v60  ;;  %355 = vmatpush.bf16.msra.mxu3 %v677_v61  ;;  %v697_v32 = vld [vmem:[%s985_s6] ss:$0 sm:$0xff] }
  0x1c   :  { %v698_v41 = vld [vmem:[%s987_s8] ss:$0 sm:$0xff] }
  0x1d   :  { %196 = vmatpush.bf16.msra.mxu1 %v511_v46  ;;  %209 = vmatpush.bf16.msra.mxu2 %v515_v48  ;;  %v699_v47 = vld [vmem:[%s989_s10] ss:$0 sm:$0xff] }
  0x1f   :  { %368 = vmatpush.bf16.msrb.mxu0 %v685_v62  ;;  %356 = vmatpush.bf16.msra.mxu3 %v676_v63 }
  0x21   :  { %197 = vmatpush.bf16.msra.mxu1 %v503_v52  ;;  %210 = vmatpush.bf16.msra.mxu2 %v507_v54 }
  0x23   :  { %369 = vmatpush.bf16.msrb.mxu0 %v684_v0  ;;  %357 = vmatpush.bf16.msra.mxu3 %v675_v1 }
  0x25   :  { %424 = vmatpush.bf16.msrb.mxu1 %v692_v13  ;;  %465 = vmatpush.bf16.msrb.mxu2 %v694_v30 }
  0x27   :  { %358 = vmatpush.bf16.msra.mxu3 %v674_v8  ;;  %370 = vmatpush.bf16.msrb.mxu0 %v683_v9 }
  0x29   :  { %425 = vmatpush.bf16.msrb.mxu1 %v691_v14  ;;  %466 = vmatpush.bf16.msrb.mxu2 %v693_v31 }
  0x2b   :  { %359 = vmatpush.bf16.msra.mxu3 %v673_v10  ;;  %371 = vmatpush.bf16.msrb.mxu0 %v682_v11 }
  0x2d   :  { %426 = vmatpush.bf16.msrb.mxu1 %v690_v28 }
  0x2f   :  { %372 = vmatpush.bf16.msrb.mxu0 %v681_v12 }
  0x31   :  { %427 = vmatpush.bf16.msrb.mxu1 %v689_v29 }
  0x8f   :  { %v82_v3 = vpop.f32.mrf.mxu0 }
  0x90   :  { %v83_v4 = vadd.f32 %v696_v2, %v82_v3 }
  0x92   :  { %v86_v5 = vmax.f32 %v83_v4, 0.0 }
  0x94   :  { %v87_v6 = vpack.c.bf16 %v86_v5, %v86_v5 }
  0x96   :  { %198 = vmatmul.bf16.vlgmr.msra.gmra.mxu1 %v87_v6  ;;  %211 = vmatmul.bf16.vlgmr.msra.gmra.mxu2 %v87_v6 }
  0x97   :  { %v84_v7 = vpop.f32.mrf.mxu0 }
 0x113   :  { %v199_v17 = vpop.f32.mrf.mxu1 }
 0x114   :  { %v200_v18 = vadd.f32 %v199_v17, %v106_v16 }
 0x116   :  { %v216_v19 = vmax.f32 %v200_v18, 0.0 }
 0x118   :  { %v218_v21 = vpack.c.bf16 %v216_v19, %v216_v19 }
 0x119   :  { %v212_v22 = vpop.f32.mrf.mxu2 }
 0x11a   :  { %v213_v23 = vadd.f32 %v212_v22, %v107_v20  ;;  %360 = vmatmul.bf16.vlgmr.msra.gmra.mxu3 %v218_v21 }
 0x11b   :  { %v201_v24 = vpop.f32.mrf.mxu1 }
 0x11c   :  { %v217_v25 = vmax.f32 %v213_v23, 0.0 }
 0x11e   :  { %v219_v26 = vpack.c.bf16 %v217_v25, %v217_v25 }
 0x120   :  { %373 = vmatmul.bf16.vlgmr.msrb.gmra.mxu0 %v219_v26 }
 0x121   :  { %v214_v27 = vpop.f32.mrf.mxu2 }
 0x19d   :  { %v361_v33 = vpop.f32.mrf.mxu3  ;;  %v374_v34 = vpop.f32.mrf.mxu0 }
 0x19e   :  { %v362_v35 = vadd.f32 %v697_v32, %v361_v33 }
 0x1a0   :  { %v375_v36 = vadd.f32 %v374_v34, %v362_v35 }
 0x1a2   :  { %v378_v37 = vmax.f32 %v375_v36, 0.0 }
 0x1a4   :  { %v379_v38 = vpack.c.bf16 %v378_v37, %v378_v37 }
 0x1a5   :  { %v363_v39 = vpop.f32.mrf.mxu3  ;;  %v376_v40 = vpop.f32.mrf.mxu0 }
 0x1a6   :  { %644 = vmatmul.msk.bf16.vlgmr.msrb.gmra.mxu1 %vm416_vm2, %v379_v38 }
 0x223   :  { %v429_v42 = vpop.f32.mrf.mxu1 }
 0x224   :  { %v430_v43 = vadd.f32 %v698_v41, %v429_v42 }
 0x226   :  { %v433_v44 = vmax.f32 %v430_v43, 0.0 }
 0x228   :  { %v434_v45 = vpack.c.bf16 %v433_v44, %v433_v44 }
 0x22a   :  { %653 = vmatmul.msk.bf16.vlgmr.msrb.gmra.mxu2 %vm455_vm3, %v434_v45 }
 0x22b   :  { %v431_v46 = vpop.f32.mrf.mxu1 }
 0x2ad   :  { %v468_v48 = vpop.f32.mrf.mxu2 }
 0x2ae   :  { %v469_v49 = vadd.f32 %v699_v47, %v468_v48 }
 0x2b0   :  { %v654_v50 = vclamps-f32 %v469_v49, 5.0 }
 0x2b2   :  { %474 = vst.msk [vmem:[#allocation2] sm:$0xff] %vm455_vm3, %v654_v50 }
 0x2b3   :  { %485 = dma.vmem_to_hbm [thread:$0]  %s481_s14, 128, %s483_s16, [#allocation3]  }
 0x2b5   :  { %v470_v51 = vpop.f32.mrf.mxu2 }
 0x2b6   :  { %724 = dma.done.wait [#allocation3], 128  }
 0x2b7   :  { %725 = vsyncadd [#allocation3], 4294967168 }
 0x2b8   :  { %490 = vsyncpa [#allocation3], 1 }

</bundles_post_ra>
